<compile_context>
chip_gen: v7x
topology: tpu7x:2x2x1
jax: 0.10.0
libtpu: 0.0.40
codegen_flags: <defaults>
</compile_context>

<pallas_src>
import math

import jax
import jax.numpy as jnp
from jax.experimental import pallas as pl
from jax.experimental.pallas import tpu as pltpu

HIDDEN_DIM = 256          # `hidden_dim = 256` in the reference module
D_MODEL = HIDDEN_DIM      # must equal hidden_dim for the broadcast add to be valid
MAX_LEN = 5000            # module default max_len
IN_FEATURES = 4           # nn.Linear(4, hidden_dim)


def _build_pe_table(max_len: int, d_model: int) -> jnp.ndarray:
    """Sin/cos positional-encoding table, shape (max_len, d_model), float32."""
    position = jnp.arange(max_len, dtype=jnp.float32)[:, None]             # (L, 1)
    div_term = jnp.exp(
        jnp.arange(0, d_model, 2, dtype=jnp.float32) * (-math.log(10000.0) / d_model)
    )                                                                       # (D/2,)
    sin = jnp.sin(position * div_term)                                      # (L, D/2)
    cos = jnp.cos(position * div_term)                                      # (L, D/2)
    # interleave -> pe[:, 0::2] = sin, pe[:, 1::2] = cos
    pe = jnp.stack([sin, cos], axis=-1).reshape(max_len, d_model)
    return pe


def _pos_enc_kernel(x_ref, w_ref, pe_ref, o_ref):
    # x_ref : (tS, B*K)  flattened (batch, in_features) per sequence row (tiny input)
    # w_ref : (K, H)     Linear weight, already transposed
    # pe_ref: (tS, H)    positional encoding with bias folded in
    # o_ref : (tS, B*H)  lane-dense output slab; [:, b*H:(b+1)*H] is batch b
    K, H = w_ref.shape
    B = x_ref.shape[-1] // K
    w = w_ref[...]
    pe = pe_ref[...]
    for b in range(B):                                   # static unroll, B is small
        xb = x_ref[:, b * K:(b + 1) * K]                 # (tS, K) static lane slice
        yb = jnp.dot(xb, w, preferred_element_type=jnp.float32) + pe
        o_ref[:, b * H:(b + 1) * H] = yb.astype(o_ref.dtype)   # 128-aligned store


def positional_encoding_forward(x, weight, bias, pe_table, *, seq_tile=512):
    """x: (S, B, 4) float32. weight: (H, 4) (PyTorch Linear layout). bias: (H,).
    pe_table: (max_len, H). Returns (S, B, H) float32."""
    S, B, K = x.shape
    H = weight.shape[0]
    assert pe_table.shape[0] >= S, "sequence longer than PE table (max_len)"

    x2 = x.reshape(S, B * K)                     # free reshape on contiguous HBM array
    w_t = weight.T.astype(jnp.float32)           # (K, H) so kernel does x @ W^T
    pe_b = pe_table[:S, :] + bias[None, :]       # fold Linear bias into PE: (S, H)

    # Sublane rule: tile rows must be a multiple of 8 or equal the full extent.
    tS = S if S <= seq_tile else seq_tile
    grid = (pl.cdiv(S, tS),)

    out2 = pl.pallas_call(
        _pos_enc_kernel,
        out_shape=jax.ShapeDtypeStruct((S, B * H), jnp.float32),
        grid_spec=pl.GridSpec(
            grid=grid,
            in_specs=[
                pl.BlockSpec((tS, B * K), lambda i: (i, 0)),   # x tile
                pl.BlockSpec((K, H), lambda i: (0, 0)),        # weight (resident)
                pl.BlockSpec((tS, H), lambda i: (i, 0)),       # pe+bias tile
            ],
            out_specs=pl.BlockSpec((tS, B * H), lambda i: (i, 0)),
        ),
        compiler_params=pltpu.CompilerParams(
            dimension_semantics=("parallel",),      # independent S tiles -> megacore on v7x
            vmem_limit_bytes=32 * 1024 * 1024,      # safe on all gens; tiles are only ~MBs
        ),
    )(x2, w_t, pe_b)

    return out2.reshape(S, B, H)


if __name__ == "__main__":
    key = jax.random.PRNGKey(0)
    k_x, k_w, k_b = jax.random.split(key, 3)

    # Small seq-first shapes consistent with the module; seq_tile=8 exercises
    # a multi-step pipelined grid (grid=(2,)).
    S, B = 16, 2

    x = jax.random.normal(k_x, (S, B, IN_FEATURES), dtype=jnp.float32)
    # nn.Linear(4, hidden_dim): weight (H, 4), bias (H,) — deterministic synthetic init
    weight = jax.random.normal(k_w, (HIDDEN_DIM, IN_FEATURES), dtype=jnp.float32) * 0.1
    bias = jax.random.normal(k_b, (HIDDEN_DIM,), dtype=jnp.float32) * 0.1
    pe_table = _build_pe_table(MAX_LEN, D_MODEL)

    out = positional_encoding_forward(x, weight, bias, pe_table, seq_tile=8)
    out = jax.block_until_ready(out)

    # Pure-JAX reference check
    ref = (x @ weight.T + bias) + pe_table[:S, None, :]
    assert out.shape == (S, B, HIDDEN_DIM)
    assert jnp.allclose(out, ref, atol=1e-5, rtol=1e-5)

    print("KERNEL_OK")
</pallas_src>

<mosaic_0001>
module attributes {stable_mosaic.version = 11 : i64} {
  func.func @_pos_enc_kernel(%arg0: i32, %arg1: memref<8x8xf32, #tpu.memory_space<vmem>>, %arg2: memref<4x256xf32, #tpu.memory_space<vmem>>, %arg3: memref<8x256xf32, #tpu.memory_space<vmem>>, %arg4: memref<8x512xf32, #tpu.memory_space<vmem>>) attributes {dimension_semantics = [#tpu.dimension_semantics<parallel>], iteration_bounds = array<i64: 2>, scalar_prefetch = 0 : i64, scratch_operands = 0 : i64, tpu.core_type = #tpu.core_type<tc>, window_params = [{transform_indices = @transform_0, window_bounds = array<i64: 8, 8>}, {pipeline_mode = #tpu.pipeline_mode<synchronous>, transform_indices = @transform_1, window_bounds = array<i64: 4, 256>}, {transform_indices = @transform_2, window_bounds = array<i64: 8, 256>}, {transform_indices = @transform_3, window_bounds = array<i64: 8, 512>}]} {
    %c0 = arith.constant 0 : index
    %c0_0 = arith.constant 0 : index
    %0 = vector.load %arg2[%c0, %c0_0] : memref<4x256xf32, #tpu.memory_space<vmem>>, vector<4x256xf32>
    %c0_1 = arith.constant 0 : index
    %c0_2 = arith.constant 0 : index
    %1 = vector.load %arg3[%c0_1, %c0_2] : memref<8x256xf32, #tpu.memory_space<vmem>>, vector<8x256xf32>
    %c0_3 = arith.constant 0 : index
    %c0_4 = arith.constant 0 : index
    %2 = vector.load %arg1[%c0_3, %c0_4] : memref<8x8xf32, #tpu.memory_space<vmem>>, vector<8x4xf32>
    %cst = arith.constant dense<0.000000e+00> : vector<8x256xf32>
    %3 = tpu.matmul %2, %0, %cst {dimension_numbers = #tpu.dot_dimension_numbers<[1], [0], [0], [1], [0, 0, 1, 1], [], []>} : vector<8x4xf32>, vector<4x256xf32>, vector<8x256xf32> -> vector<8x256xf32>
    %4 = arith.addf %3, %1 : vector<8x256xf32>
    %c0_5 = arith.constant 0 : index
    %c0_6 = arith.constant 0 : index
    %5 = vector.load %arg4[%c0_5, %c0_6] : memref<8x512xf32, #tpu.memory_space<vmem>>, vector<8x256xf32>
    tpu.vector_store %arg4[%c0_5, %c0_6], %4 {strides = array<i32>} : memref<8x512xf32, #tpu.memory_space<vmem>>, vector<8x256xf32>,
    %c0_7 = arith.constant 0 : index
    %c4 = arith.constant 4 : index
    %6 = vector.load %arg1[%c0_7, %c4] : memref<8x8xf32, #tpu.memory_space<vmem>>, vector<8x4xf32>
    %cst_8 = arith.constant dense<0.000000e+00> : vector<8x256xf32>
    %7 = tpu.matmul %6, %0, %cst_8 {dimension_numbers = #tpu.dot_dimension_numbers<[1], [0], [0], [1], [0, 0, 1, 1], [], []>} : vector<8x4xf32>, vector<4x256xf32>, vector<8x256xf32> -> vector<8x256xf32>
    %8 = arith.addf %7, %1 : vector<8x256xf32>
    %c0_9 = arith.constant 0 : index
    %c256 = arith.constant 256 : index
    %9 = vector.load %arg4[%c0_9, %c256] : memref<8x512xf32, #tpu.memory_space<vmem>>, vector<8x256xf32>
    tpu.vector_store %arg4[%c0_9, %c256], %8 {strides = array<i32>} : memref<8x512xf32, #tpu.memory_space<vmem>>, vector<8x256xf32>,
    return
  }
  func.func @transform_0(%arg0: i32) -> (i32, i32) {
    %c0_i32 = arith.constant 0 : i32
    %c0_i32_0 = arith.constant 0 : i32
    return %arg0, %c0_i32 : i32, i32
  }
  func.func @transform_1(%arg0: i32) -> (i32, i32) {
    %c0_i32 = arith.constant 0 : i32
    %c0_i32_0 = arith.constant 0 : i32
    %c0_i32_1 = arith.constant 0 : i32
    return %c0_i32, %c0_i32_0 : i32, i32
  }
  func.func @transform_2(%arg0: i32) -> (i32, i32) {
    %c0_i32 = arith.constant 0 : i32
    %c0_i32_0 = arith.constant 0 : i32
    return %arg0, %c0_i32 : i32, i32
  }
  func.func @transform_3(%arg0: i32) -> (i32, i32) {
    %c0_i32 = arith.constant 0 : i32
    %c0_i32_0 = arith.constant 0 : i32
    return %arg0, %c0_i32 : i32, i32
  }
}

</mosaic_0001>

<bundles_post_ra>
// kernel: tpu_custom_call.1
= control target key start
LH: loop header
LB: loop body
LE: loop exit
PB: predicated region body
PF: predicated region fallthrough
CT: control target
= control target key end

     0   :  { %8 = vsyncpa [#allocation3], 0  ;;  %s832_s0 = inlined_call_operand.vmem [shape: f32[16,8], index: 0, kind: input, shape index: {}]   ;;  %s833_s1 = inlined_call_operand.vmem [shape: f32[4,256], index: 1, kind: input, shape index: {}]   ;;  %s834_s2 = inlined_call_operand.hbm [shape: f32[16,256], index: 2, kind: input, shape index: {}]   ;;  %s835_s3 = inlined_call_operand.hbm [shape: f32[16,512], index: 3, kind: output, shape index: {}]  }
   0x1   :  { %10 = vsyncpa [#allocation3 + $0x1], 0 }
   0x2   :  { %11 = vsyncpa [#allocation4], 0 }
   0x3   :  { %13 = vsyncpa [#allocation4 + $0x1], 0  ;;  %s662_s12 = smov 0   ;;  %s664_s13 = smov 0  }
   0x4   :  { %s666_s14 = smov 0   ;;  %s668_s15 = smov 0  }
   0x5 LB: > { %s683_s16 = sadd.s32 4294967295, %s636_s15   ;;  %s468_s17 = sadd.s32 4294967294, %s636_s15   ;;  %s636_s15 = sphi %s668_s15, %s850_s15   ;;  %s632_s14 = sphi %s666_s14, %s849_s14   ;;  %s628_s13 = sphi %s664_s13, %s848_s13   ;;  %s624_s12 = sphi %s662_s12, %s847_s12  }
   0x6   : > { %s687_s18 = sadd.s32 1, %s636_s15   ;;  %s73_s19 = sadd.s32 1, %s632_s14 }
   0x7   : > { %s70_s20 = ssub.s32 %s636_s15, %s687_s18  ;;  %p80_p0 = scmp.ne.s32.totalorder %s632_s14, %s628_s13 }
   0x8   : > { %p71_p1 = scmp.eq.s32.totalorder %s70_s20, 0  ;;  %p81_p2 = scmp.eq.s32.totalorder %s636_s15, 0 }
   0x9   : > { %p86_p3 = scmp.ne.s32.totalorder %s628_s13, %s624_s12  ;;  %p87_p4 = scmp.eq.s32.totalorder %s683_s16, 0 }
   0xa   : > { %s699_s21 = scalar_select %p71_p1, %s632_s14, %s73_s19  }
   0xb   : > { %p701_p5 = por %p81_p2, %p80_p0  ;;  %p705_p6 = por %p87_p4, %p86_p3 }
   0xc   : > { %p110_p7 = scmp.eq.s32.totalorder %s683_s16, 1  ;;  %p116_p8 = scmp.eq.s32.totalorder %s468_s17, 1 }
   0xd   : > { %p503_p10 = scmp.lt.s32.totalorder %s636_s15, 2  ;;  %s146_s26 = sand.u32 1, %s632_s14  }
   0xe   : > { %p712_p11 = por %p110_p7, %p80_p0  ;;  %p716_p12 = por %p116_p8, %p86_p3 }
   0xf   : > { %s489_s27 = sshll.u32 %s636_s15, 8  ;;  %s471_s28 = sshll.u32 %s146_s26, 4 }
  0x10   : > { %s839_s24 = scalar_select %p712_p11, 1, 0 }
  0x11   : > { %s840_s25 = scalar_select %p716_p12, 1, 0 }
  0x12   : > { %s725_s4 = scalar_lea.hbm %s834_s2, %s489_s27  ;;  %s150_s5 = scalar_lea.vmem [#allocation2], %s471_s28 }
  0x13   : > { %s158_s6 = sshll.u32 %s150_s5, 4  ;;  %p729_p13 = pnand %p503_p10, %p701_p5  ;;  %s733_s6 = int_to_ptr.vmem [resolvable:$true] %s158_s6 }
  0x14   : > { %s147_s8 = scalar_lea.sflag [#allocation3], %s146_s26  ;;  %s540_s9 = scalar_lea.hbm %s725_s4, 256 }
  0x15   : > { %p541_p2 = scmp.ne.s32.totalorder %s725_s4, %s540_s9  ;;  %p542_p3 = pneg %p729_p13 }
  0x16   : > { %s545_s17 = scalar_lea.hbm %s834_s2, 512  ;;  %p546_p5 = scmp.lt.u32.totalorder %s725_s4, %s834_s2 }
  0x17   : > { %p543_p4 = pnand %p542_p3, %p541_p2  ;;  %p547_p8 = scmp.lt.u32.totalorder %s545_s17, %s540_s9 }
  0x18   : > { %p549_p9 = scmp.lt.u32.totalorder %s540_s9, %s725_s4 }
  0x19   : > { %p544_p7 = pneg %p543_p4  ;;  %p548_p10 = por %p547_p8, %p546_p5 }
  0x1b   : > { %p550_p0 = por %p549_p9, %p548_p10 }
  0x1d   : > { %p551_p1 = pnand %p550_p0, %p544_p7 }
  0x1f   : > { %554 = shalt.err (!%p551_p1)
}
  0x20   : > { %s555_s22 = scalar_lea.vmem %s733_s6, 256  ;;  %s638_s26 = smov [#allocation2]  }
  0x21   : > { %p556_p2 = scmp.ne.s32.totalorder %s733_s6, %s555_s22  ;;  %s560_s27 = sshll.u32 %s638_s26, 4  ;;  %s561_s27 = int_to_ptr.vmem [resolvable:$false] %s560_s27 }
  0x22   : > { %s562_s28 = scalar_lea.vmem %s561_s27, 512  ;;  %p563_p11 = scmp.lt.s32.totalorder %s733_s6, %s561_s27 }
  0x23   : > { %p558_p4 = pnand %p556_p2, %p542_p3  ;;  %p564_p5 = scmp.lt.s32.totalorder %s562_s28, %s555_s22 }
  0x25   : > { %p559_p12 = pneg %p558_p4  ;;  %p565_p8 = por %p564_p5, %p563_p11 }
  0x27   : > { %p566_p9 = pnand %p565_p8, %p559_p12 }
  0x29   : > { %569 = shalt.err (!%p566_p9)
}
  0x2a   : > { %498 = dma.hbm_to_vmem [thread:$0]  (!%p729_p13), %s725_s4, 256, %s733_s6, %s147_s8  }
  0x2b   : > { %p842_p0 = scmp.lt.s32.totalorder %s636_s15, 3  ;;  %p843_p1 = scmp.ge.s32.totalorder %s636_s15, 1 }
  0x2d   : > { %p164_p3 = pnand %p843_p1, %p842_p0 }
  0x2e   : > { %s767_s29 = sand.u32 (!%p164_p3), 1, %s628_s13  }
  0x2f   : > { %167 = sbr.rel (%p164_p3) target bundleno = 406 (0x196), region = 32  ;;  %s475_s30 = sshll.u32 (!%p164_p3), %s767_s29, 4 }
  0x30   : > { %s170_s5 = scalar_lea.sflag (!%p164_p3), [#allocation3], %s767_s29  ;;  %s173_s9 = scalar_lea.vmem (!%p164_p3), [#allocation2], %s475_s30 }
  0x36   : > { %615 = dma.done.wait (%p705_p6), %s170_s5, 256  }
  0x37   : > { %617 = vsyncadd (%p705_p6), %s170_s5, 4294967040  ;;  %p200_p11 = scmp.lt.s32.totalorder %s683_s16, 1  ;;  %v639_v0 = vmov 0.0   ;;  %v204_v2 = vld [vmem:[%s833_s1] sm:$0xff]  ;;  %vm214_vm0 = vcmask 1043456   ;;  %s640_s23 = smov 124  }
  0x38   : > { %283 = vmatprep.mubr.f32.mxu0 %v639_v0  ;;  %362 = vmatprep.mubr.f32.mxu1 %v639_v0  ;;  %v209_v3 = vcombine.high %v204_v2, %v204_v2  ;;  %vm210_vm1 = vcmask 31744   ;;  %s476_s19 = sshll.u32 %s767_s29, 5  ;;  %v205_v5 = vld [vmem:[%s173_s9] sm:$0xff]  ;;  %v206_v6 = vld [vmem:[%s173_s9 + $0x8] sm:$0xff]  ;;  %s490_s22 = sshll.u32 %s683_s16, 9 }
  0x39   : > { %s201_s4 = scalar_select %p200_p11, %s683_s16, 1 }
  0x3a   : > { %478 = vmatprep.subr.msk.mxu0 %vm214_vm0, %v209_v3  ;;  %481 = vmatprep.subr.msk.mxu1 %vm214_vm0, %v209_v3  ;;  %s199_s20 = scalar_lea.vmem [#allocation5], %s476_s19  ;;  %s788_s30 = scalar_lea.hbm %s835_s3, %s490_s22 }
  0x3b   : > { %s477_s6 = sshll.u32 %s201_s4, 3  ;;  %479 = vmatpush1.msk.msra.mxu0 %vm214_vm0, %v204_v2  ;;  %482 = vmatpush1.msk.msra.mxu1 %vm214_vm0, %v204_v2  ;;  %s386_s26 = sshll.u32 %s199_s20, 4  ;;  %s790_s26 = int_to_ptr.vmem [resolvable:$true] %s386_s26 }
  0x3c   : > { %s203_s10 = scalar_lea.vmem %s832_s0, %s477_s6  ;;  %s372_s5 = scalar_lea.sflag [#allocation4], %s767_s29 }
  0x3d   : > { %v207_v1 = vld [vmem:[%s203_s10] sm:$0xff]  ;;  %s570_s9 = scalar_lea.vmem %s790_s26, 512  ;;  %p844_p12 = scmp.ne.s32.totalorder %s839_s24, 0 }
  0x3e   : > { %294 = vrot.lane.b32.xlu0 %v207_v1, %s640_s23  ;;  %480 = vmatmul.mubr.msk.f32.vlgmr.msra.gmra.mrb[0].mxu0 %vm210_vm1, %v207_v1  ;;  %p571_p6 = scmp.ne.s32.totalorder %s790_s26, %s570_s9  ;;  %s641_s16 = smov [#allocation5]  }
  0x3f   : > { %s574_s4 = sshll.u32 %s641_s16, 4  ;;  %s575_s4 = int_to_ptr.vmem [resolvable:$false] %s574_s4 }
  0x40   : > { %p572_p13 = pnand %p571_p6, %p844_p12  ;;  %s576_s6 = scalar_lea.vmem %s575_s4, 1024 }
  0x41   : > { %p577_p10 = scmp.lt.s32.totalorder %s790_s26, %s575_s4  ;;  %p578_p2 = scmp.lt.s32.totalorder %s576_s6, %s570_s9 }
  0x42   : > { %p573_p7 = pneg %p572_p13 }
  0x43   : > { %p579_p4 = por %p578_p2, %p577_p10 }
  0x45   : > { %p580_p5 = pnand %p579_p4, %p573_p7 }
  0xb0   : > { %v295_v4 = vpop.permute.xlu0 %294 }
  0xb1   : > { %483 = vmatmul.mubr.msk.f32.vlgmr.msra.gmra.mrb[0].mxu1 %vm210_vm1, %v295_v4 }
 0x111   : > { %v285_v7 = vpop.f32.mrb[0].mxu0 }
 0x112   : > { %v286_v8 = vadd.f32 %v285_v7, %v205_v5  ;;  %v287_v9 = vpop.f32.mrb[1].mxu0 }
 0x113   : > { %v288_v10 = vadd.f32 %v287_v9, %v206_v6 }
 0x114   : > { %290 = vst [vmem:[%s199_s20] sm:$0xff] %v286_v8 }
 0x115   : > { %291 = vst [vmem:[%s199_s20 + $0x8] sm:$0xff] %v288_v10 }
 0x184   : > { %v364_v11 = vpop.f32.mrb[0].mxu1 }
 0x185   : > { %v365_v12 = vadd.f32 %v364_v11, %v205_v5  ;;  %v366_v13 = vpop.f32.mrb[1].mxu1 }
 0x186   : > { %v367_v14 = vadd.f32 %v366_v13, %v206_v6 }
 0x187   : > { %369 = vst [vmem:[%s199_s20 + $0x10] sm:$0xff] %v365_v12 }
 0x188   : > { %370 = vst [vmem:[%s199_s20 + $0x18] sm:$0xff] %v367_v14 }
 0x189   : > { %583 = shalt.err (!%p580_p5)
}
 0x18a   : > { %s584_s29 = scalar_lea.hbm %s788_s30, 512  ;;  %s588_s10 = scalar_lea.hbm %s835_s3, 1024 }
 0x18b   : > { %p585_p8 = scmp.ne.s32.totalorder %s788_s30, %s584_s29  ;;  %p589_p1 = scmp.lt.u32.totalorder %s788_s30, %s835_s3 }
 0x18c   : > { %p590_p3 = scmp.lt.u32.totalorder %s588_s10, %s584_s29  ;;  %p592_p6 = scmp.lt.u32.totalorder %s584_s29, %s788_s30 }
 0x18d   : > { %p586_p9 = pnand %p585_p8, %p844_p12 }
 0x18e   : > { %p591_p11 = por %p590_p3, %p589_p1 }
 0x18f   : > { %p587_p0 = pneg %p586_p9 }
 0x190   : > { %p593_p13 = por %p592_p6, %p591_p11 }
 0x192   : > { %p594_p7 = pnand %p593_p13, %p587_p0 }
 0x194   : > { %597 = shalt.err (!%p594_p7)
}
 0x195   : > { %493 = dma.vmem_to_hbm [thread:$0]  (%p844_p12), %s790_s26, 512, %s788_s30, %s372_s5  }
 0x196 PF: > { %s398_s23 = sand.u32 1, %s624_s12   ;;  %p845_p10 = scmp.ne.s32.totalorder %s840_s25, 0 }
 0x197   : > { %p846_p2 = scmp.ge.s32.totalorder %s636_s15, 2  ;;  %s399_s19 = scalar_lea.sflag [#allocation4], %s398_s23 }
 0x199   : > { %p500_p4 = pnand %p846_p2, %p845_p10 }
 0x19b   : > { %619 = dma.done.wait (!%p500_p4), %s399_s19, 512  }
 0x19c   : > { %621 = vsyncadd (!%p500_p4), %s399_s19, 4294966784  ;;  %p16_p5 = scmp.ge.s32.totalorder %s687_s18, 4   ;;  %s847_s12 = smov %s628_s13 }
 0x19d   : > { %s848_s13 = smov %s632_s14  ;;  %s849_s14 = smov %s699_s21 }
 0x19e   : > { %s850_s15 = smov %s687_s18  ;;  %18 = sbr.rel (!%p16_p5) target bundleno = 5 (0x5), region = 80 }
 0x1a5   :  { %404 = vsyncpa [#allocation3], 1 }
 0x1a6   :  { %406 = vsyncpa [#allocation3 + $0x1], 1 }
 0x1a7   :  { %407 = vsyncpa [#allocation4], 1 }
 0x1a8   :  { %409 = vsyncpa [#allocation4 + $0x1], 1 }

</bundles_post_ra>
